<compile_context>
chip_gen: v6e
topology: v6e:2x2x1
jax: 0.10.0
libtpu: 0.0.40
codegen_flags: <defaults>
</compile_context>

<pallas_src>
import functools

import jax
import jax.numpy as jnp
from jax.experimental import pallas as pl
from jax.experimental.pallas import tpu as pltpu


_MAX_TILE_M = 512
_MAX_TILE_N = 512
_MAX_SINGLE_STEP_K = 2048      # use the whole K as one block up to this size
_MULTI_STEP_TK = 512
_VMEM_LIMIT = 48 * 1024 * 1024  # safe on v7x (64 MiB phys); v5e/v6e have 128 MiB


def _round_up(x, m):
    return ((x + m - 1) // m) * m


# ----------------------------- kernel -------------------------------------- #

def _shared_dot_kernel(*refs, k_axis, has_bias, acc_is_out):
    """Refs: w (TM,TK), x (TK,TN), [bias (TM,1)], out (TM,TN), [acc (TM,TN) f32]."""
    idx = 0
    w_ref = refs[idx]; idx += 1
    x_ref = refs[idx]; idx += 1
    b_ref = None
    if has_bias:
        b_ref = refs[idx]; idx += 1
    o_ref = refs[idx]; idx += 1

    if k_axis is None:
        # Whole reduction fits in one block: compute + bias + store directly.
        acc = jnp.dot(w_ref[...], x_ref[...], preferred_element_type=jnp.float32)
        if has_bias:
            acc = acc + b_ref[...].astype(jnp.float32)
        o_ref[...] = acc.astype(o_ref.dtype)
        return

    # Multi-K-step path: accumulate across the innermost grid axis.
    acc_ref = o_ref if acc_is_out else refs[idx]
    k = pl.program_id(k_axis)

    @pl.when(k == 0)
    def _init():
        acc_ref[...] = jnp.zeros_like(acc_ref)

    acc_ref[...] += jnp.dot(w_ref[...], x_ref[...],
                            preferred_element_type=jnp.float32)

    if has_bias or not acc_is_out:
        @pl.when(k == pl.num_programs(k_axis) - 1)
        def _finalize():
            res = acc_ref[...]
            if has_bias:
                res = res + b_ref[...].astype(res.dtype)
            o_ref[...] = res.astype(o_ref.dtype)


# ----------------------------- wrapper ------------------------------------- #

@functools.partial(jax.jit, static_argnames=("compute_dtype",))
def shared_dot(x, weight, bias=None, *, compute_dtype=None):
    """x: (B, I, N), weight: (C, O, I), bias: (C, O) or None.

    Returns (B, C, O, N), or (B, O, N) if C == 1 (matches torch squeeze_(1)).
    `compute_dtype=jnp.bfloat16` is an opt-in precision trade-off (MXU-native
    operands, f32 accumulation)."""
    B, I, N = x.shape
    C, O, Iw = weight.shape
    assert I == Iw, (I, Iw)

    out_dtype = jnp.result_type(x.dtype, weight.dtype)
    if compute_dtype is not None:
        x = x.astype(compute_dtype)
        weight = weight.astype(compute_dtype)

    M, K = C * O, I
    w2 = weight.reshape(M, K)                       # (C*O, I), copy-free

    # ------------------------------- tiling -------------------------------- #
    # K (reduction): whole K as one block whenever it fits; else 512-wide steps.
    if K <= _MAX_SINGLE_STEP_K:
        TK, K_pad = K, K
    else:
        TK, K_pad = _MULTI_STEP_TK, _round_up(K, _MULTI_STEP_TK)
    nk = K_pad // TK

    # M (= C*O): full dim in one tile if it fits (zero padding), else 512.
    if M <= _MAX_TILE_M:
        TM, M_pad = M, M
    else:
        TM, M_pad = _MAX_TILE_M, _round_up(M, _MAX_TILE_M)

    # Layout choice: batch as a grid axis (no transposes) unless N is lane-sparse.
    batch_grid = (N >= 128) or (B == 1)
    Ncol = N if batch_grid else B * N
    if Ncol <= _MAX_TILE_N:
        TN, N_pad = Ncol, Ncol
    else:
        TN, N_pad = _MAX_TILE_N, _round_up(Ncol, _MAX_TILE_N)

    nm, nn = M_pad // TM, N_pad // TN

    # Guarantee >= 2 parallel grid tiles so both v7x TensorCores get work.
    n_parallel = (B if batch_grid else 1) * nm * nn
    if n_parallel == 1 and M >= 16:
        TM = _round_up((M + 1) // 2, 8)
        M_pad = _round_up(M, TM)
        nm = M_pad // TM

    multi_k = nk > 1
    acc_is_out = multi_k and (out_dtype == jnp.float32)

    # ---------------------------- pad operands ----------------------------- #
    if (M_pad, K_pad) != (M, K):
        w2 = jnp.pad(w2, ((0, M_pad - M), (0, K_pad - K)))

    has_bias = bias is not None
    if has_bias:
        b2 = bias.reshape(M, 1)
        if M_pad != M:
            b2 = jnp.pad(b2, ((0, M_pad - M), (0, 0)))

    if batch_grid:
        x_in = x
        if (K_pad, N_pad) != (K, N):
            x_in = jnp.pad(x, ((0, 0), (0, K_pad - K), (0, N_pad - N)))
    else:
        # Fold B into the lane dim: (B, I, N) -> (I, B*N).
        x_in = jnp.transpose(x, (1, 0, 2)).reshape(K, B * N)
        if (K_pad, N_pad) != (K, Ncol):
            x_in = jnp.pad(x_in, ((0, K_pad - K), (0, N_pad - Ncol)))

    # ---------------------------- grid & specs ----------------------------- #
    if batch_grid:
        grid = (B, nm, nn) + ((nk,) if multi_k else ())
        if multi_k:
            w_spec = pl.BlockSpec((TM, TK), lambda b, i, j, k: (i, k))
            x_spec = pl.BlockSpec((None, TK, TN), lambda b, i, j, k: (b, k, j))
            o_spec = pl.BlockSpec((None, TM, TN), lambda b, i, j, k: (b, i, j))
            b_spec = pl.BlockSpec((TM, 1), lambda b, i, j, k: (i, 0))
        else:
            w_spec = pl.BlockSpec((TM, TK), lambda b, i, j: (i, 0))
            x_spec = pl.BlockSpec((None, TK, TN), lambda b, i, j: (b, 0, j))
            o_spec = pl.BlockSpec((None, TM, TN), lambda b, i, j: (b, i, j))
            b_spec = pl.BlockSpec((TM, 1), lambda b, i, j: (i, 0))
        out_struct = jax.ShapeDtypeStruct((B, M_pad, N_pad), out_dtype)
    else:
        grid = (nm, nn) + ((nk,) if multi_k else ())
        if multi_k:
            w_spec = pl.BlockSpec((TM, TK), lambda i, j, k: (i, k))
            x_spec = pl.BlockSpec((TK, TN), lambda i, j, k: (k, j))
            o_spec = pl.BlockSpec((TM, TN), lambda i, j, k: (i, j))
            b_spec = pl.BlockSpec((TM, 1), lambda i, j, k: (i, 0))
        else:
            w_spec = pl.BlockSpec((TM, TK), lambda i, j: (i, 0))
            x_spec = pl.BlockSpec((TK, TN), lambda i, j: (0, j))
            o_spec = pl.BlockSpec((TM, TN), lambda i, j: (i, j))
            b_spec = pl.BlockSpec((TM, 1), lambda i, j: (i, 0))
        out_struct = jax.ShapeDtypeStruct((M_pad, N_pad), out_dtype)

    in_specs = [w_spec, x_spec]
    operands = [w2, x_in]
    if has_bias:
        in_specs.append(b_spec)
        operands.append(b2)

    scratch = []
    if multi_k and not acc_is_out:
        scratch.append(pltpu.VMEM((TM, TN), jnp.float32))

    if multi_k:
        semantics = ("parallel",) * (len(grid) - 1) + ("arbitrary",)
    else:
        semantics = ("parallel",) * len(grid)

    n_batch = B if batch_grid else 1
    in_item = jnp.dtype(x_in.dtype).itemsize
    cost = pl.CostEstimate(
        flops=2 * n_batch * M_pad * K_pad * N_pad,
        transcendentals=0,
        bytes_accessed=(M_pad * K_pad + n_batch * K_pad * N_pad) * in_item
        + n_batch * M_pad * N_pad * jnp.dtype(out_dtype).itemsize,
    )

    kernel = functools.partial(
        _shared_dot_kernel,
        k_axis=(len(grid) - 1) if multi_k else None,
        has_bias=has_bias,
        acc_is_out=acc_is_out,
    )

    out = pl.pallas_call(
        kernel,
        out_shape=out_struct,
        grid=grid,
        in_specs=in_specs,
        out_specs=o_spec,
        scratch_shapes=scratch,
        compiler_params=pltpu.CompilerParams(
            dimension_semantics=semantics,
            vmem_limit_bytes=_VMEM_LIMIT,
        ),
        cost_estimate=cost,
    )(*operands)

    # ------------------------------- un-fold -------------------------------- #
    if batch_grid:
        out = out[:, :M, :N].reshape(B, C, O, N)        # copy-free reshape
    else:
        out = out[:M, :Ncol].reshape(C, O, B, N)
        out = jnp.transpose(out, (2, 0, 1, 3))
    if C == 1:
        out = out[:, 0]                                 # torch squeeze_(1)
    return out


# --------------------------- param init ------------------------------------ #

def init_shared_dot_params(key, in_features, out_features, n_channels,
                           bias=True, init_weight=None, init_bias=None,
                           dtype=jnp.float32):
    """Mirrors SharedDot.reset_parameters."""
    wkey, _ = jax.random.split(key)
    if init_weight is not None:
        bound = float(init_weight)
    else:
        # kaiming_uniform_(a=0) on a 3-D (C, O, I) tensor: fan_in = O * I
        fan_in = out_features * in_features
        bound = (6.0 / fan_in) ** 0.5
    weight = jax.random.uniform(
        wkey, (n_channels, out_features, in_features),
        minval=-bound, maxval=bound, dtype=dtype)
    if bias:
        b_val = float(init_bias) if init_bias is not None else 0.0
        bias_p = jnp.full((n_channels, out_features), b_val, dtype=dtype)
    else:
        bias_p = None
    return weight, bias_p


# ------------------------------- demo --------------------------------------- #

if __name__ == "__main__":
    key = jax.random.PRNGKey(0)
    k_x, k_p, k_x3, k_p3, k_x4, k_p4 = jax.random.split(key, 6)
    HI = jax.lax.Precision.HIGHEST

    # 1) Small-N path (batch folded into lanes), bias, C > 1.
    B, C, in_f, out_f, N = 2, 4, 32, 32, 16
    w, b = init_shared_dot_params(k_p, in_f, out_f, C, bias=True, init_bias=0.1)
    x = jax.random.normal(k_x, (B, in_f, N), dtype=jnp.float32)
    out = jax.block_until_ready(shared_dot(x, w, b))
    ref = jnp.einsum("coi,bin->bcon", w, x, precision=HI) + b[None, :, :, None]
    assert out.shape == (B, C, out_f, N), out.shape
    assert jnp.allclose(out, ref, atol=2e-4, rtol=2e-5)

    # 2) C == 1, no bias (exercises squeeze_(1) behaviour).
    w1, _ = init_shared_dot_params(k_p, in_f, out_f, 1, bias=False)
    out1 = jax.block_until_ready(shared_dot(x, w1, None))
    ref1 = jnp.einsum("coi,bin->bcon", w1, x, precision=HI)[:, 0]
    assert out1.shape == (B, out_f, N), out1.shape
    assert jnp.allclose(out1, ref1, atol=2e-4, rtol=2e-5)

    # 3) Large-N path (batch as a grid axis, no wrapper transposes), no bias.
    B3, C3, in3, of3, N3 = 2, 2, 32, 24, 128
    w3, _ = init_shared_dot_params(k_p3, in3, of3, C3, bias=False)
    x3 = jax.random.normal(k_x3, (B3, in3, N3), dtype=jnp.float32)
    out3 = jax.block_until_ready(shared_dot(x3, w3, None))
    ref3 = jnp.einsum("coi,bin->bcon", w3, x3, precision=HI)
    assert out3.shape == (B3, C3, of3, N3), out3.shape
    assert jnp.allclose(out3, ref3, atol=2e-4, rtol=2e-5)

    # 4) Multi-K-step path (in_features > single-step threshold), bias, C == 1.
    B4, C4, in4, of4, N4 = 1, 1, 2304, 8, 128
    w4, b4 = init_shared_dot_params(k_p4, in4, of4, C4, bias=True, init_bias=0.05)
    x4 = jax.random.normal(k_x4, (B4, in4, N4), dtype=jnp.float32)
    out4 = jax.block_until_ready(shared_dot(x4, w4, b4))
    ref4 = (jnp.einsum("coi,bin->bcon", w4, x4, precision=HI)
            + b4[None, :, :, None])[:, 0]
    assert out4.shape == (B4, of4, N4), out4.shape
    assert jnp.allclose(out4, ref4, atol=2e-4, rtol=2e-5)

    print("KERNEL_OK")
</pallas_src>

<mosaic_0001>
module attributes {stable_mosaic.version = 11 : i64} {
  func.func @_shared_dot_kernel(%arg0: i32, %arg1: i32, %arg2: memref<64x32xf32, #tpu.memory_space<vmem>>, %arg3: memref<32x32xf32, #tpu.memory_space<vmem>>, %arg4: memref<64x1xf32, #tpu.memory_space<vmem>>, %arg5: memref<64x32xf32, #tpu.memory_space<vmem>>) attributes {dimension_semantics = [#tpu.dimension_semantics<parallel>, #tpu.dimension_semantics<parallel>], iteration_bounds = array<i64: 2, 1>, scalar_prefetch = 0 : i64, scratch_operands = 0 : i64, tpu.core_type = #tpu.core_type<tc>, window_params = [{transform_indices = @transform_0, window_bounds = array<i64: 64, 32>}, {transform_indices = @transform_1, window_bounds = array<i64: 32, 32>}, {transform_indices = @transform_2, window_bounds = array<i64: 64, 1>}, {transform_indices = @transform_3, window_bounds = array<i64: 64, 32>}]} {
    %c0 = arith.constant 0 : index
    %c0_0 = arith.constant 0 : index
    %0 = vector.load %arg2[%c0, %c0_0] : memref<64x32xf32, #tpu.memory_space<vmem>>, vector<64x32xf32>
    %c0_1 = arith.constant 0 : index
    %c0_2 = arith.constant 0 : index
    %1 = vector.load %arg3[%c0_1, %c0_2] : memref<32x32xf32, #tpu.memory_space<vmem>>, vector<32x32xf32>
    %cst = arith.constant dense<0.000000e+00> : vector<64x32xf32>
    %2 = tpu.matmul %0, %1, %cst {dimension_numbers = #tpu.dot_dimension_numbers<[1], [0], [0], [1], [0, 0, 1, 1], [], []>} : vector<64x32xf32>, vector<32x32xf32>, vector<64x32xf32> -> vector<64x32xf32>
    %c0_3 = arith.constant 0 : index
    %c0_4 = arith.constant 0 : index
    %3 = vector.load %arg4[%c0_3, %c0_4] : memref<64x1xf32, #tpu.memory_space<vmem>>, vector<64x1xf32>
    %4 = vector.broadcast %3 : vector<64x1xf32> to vector<64x32xf32>
    %5 = arith.addf %2, %4 : vector<64x32xf32>
    %c0_5 = arith.constant 0 : index
    %c0_6 = arith.constant 0 : index
    %6 = vector.load %arg5[%c0_5, %c0_6] : memref<64x32xf32, #tpu.memory_space<vmem>>, vector<64x32xf32>
    tpu.vector_store %arg5[%c0_5, %c0_6], %5 {strides = array<i32>} : memref<64x32xf32, #tpu.memory_space<vmem>>, vector<64x32xf32>,
    return
  }
  func.func @transform_0(%arg0: i32, %arg1: i32) -> (i32, i32) {
    %c0_i32 = arith.constant 0 : i32
    %c0_i32_0 = arith.constant 0 : i32
    return %arg0, %c0_i32 : i32, i32
  }
  func.func @transform_1(%arg0: i32, %arg1: i32) -> (i32, i32) {
    %c0_i32 = arith.constant 0 : i32
    %c0_i32_0 = arith.constant 0 : i32
    return %c0_i32, %arg1 : i32, i32
  }
  func.func @transform_2(%arg0: i32, %arg1: i32) -> (i32, i32) {
    %c0_i32 = arith.constant 0 : i32
    %c0_i32_0 = arith.constant 0 : i32
    return %arg0, %c0_i32 : i32, i32
  }
  func.func @transform_3(%arg0: i32, %arg1: i32) -> (i32, i32) {
    %c0_i32 = arith.constant 0 : i32
    return %arg0, %arg1 : i32, i32
  }
}

</mosaic_0001>

<bundles_post_ra>
// kernel: shared_dot.1
= control target key start
LH: loop header
LB: loop body
LE: loop exit
PB: predicated region body
PF: predicated region fallthrough
CT: control target
= control target key end

     0   :  { %s667_s12 = smov 0   ;;  %s669_s13 = smov 0   ;;  %s746_s0 = inlined_call_operand.vmem [shape: f32[128,32], index: 0, kind: input, shape index: {}]   ;;  %s747_s1 = inlined_call_operand.vmem [shape: f32[32,32], index: 1, kind: input, shape index: {}]   ;;  %s748_s2 = inlined_call_operand.vmem [shape: f32[128,1], index: 2, kind: input, shape index: {}]   ;;  %s749_s3 = inlined_call_operand.vmem [shape: f32[128,32], index: 3, kind: output, shape index: {}]  }
   0x1   :  { %s671_s14 = smov 0  }
   0x2 LB: > { %s25_s15 = sadd.s32 1, %s640_s13  ;;  %p538_p0 = scmp.ge.s32.totalorder %s644_s14, 1  ;;  %s644_s14 = sphi %s671_s14, %s13_s14   ;;  %s640_s13 = sphi %s669_s13, %s751_s13   ;;  %s636_s12 = sphi %s667_s12, %s750_s12  }
   0x3   : > { %p27_p1 = scmp.ge.s32.totalorder %s25_s15, 2  ;;  %p172_p2 = scmp.lt.s32.totalorder %s644_s14, 3 }
   0x5   : > { %s753_s15 = smov (%p27_p1, %s25_s15), 0  ;;  %p173_p3 = pnand %p538_p0, %p172_p2 }
   0x6   : > { %s539_s20 = sshll.u32 (!%p173_p3), %s636_s12, 3 }
   0x7   : > { %176 = sbr.rel (%p173_p3) target bundleno = 224 (0xe0), region = 32  ;;  %p209_p4 = scmp.lt.s32.totalorder (!%p173_p3), %s539_s20, 15 }
   0xc   : > { %v244_v0 = vld [vmem:[%s747_s1 + $0x18] sm:$0xff]  ;;  %v243_v1 = vld [vmem:[%s747_s1 + $0x10] sm:$0xff]  ;;  %v242_v2 = vld [vmem:[%s747_s1 + $0x8] sm:$0xff]  ;;  %s755_s20 = smov (!%p209_p4, %s539_s20), 15  ;;  %vm293_vm0 = vcmask 261120   ;;  %v646_v14 = vmov 0  }
   0xd   : > { %567 = vmatprep.subr.mxu0 %v244_v0  ;;  %587 = vmatprep.subr.mxu1 %v244_v0  ;;  %v241_v3 = vld [vmem:[%s747_s1] sm:$0xff]  ;;  %s697_s25 = sshll.u32 %s755_s20, 3 }
   0xe   : > { %568 = vmatpush3.msra.mxu0 %v244_v0  ;;  %591 = vmatpush3.msra.mxu1 %v244_v0  ;;  %s212_s28 = scalar_lea.vmem %s746_s0, %s697_s25  ;;  %s707_s4 = scalar_lea.vmem %s748_s2, %s697_s25 }
   0xf   : > { %569 = vmatprep.subr.mxu0 %v243_v1  ;;  %588 = vmatprep.subr.mxu1 %v243_v1  ;;  %v233_v4 = vld [vmem:[%s212_s28] sm:$0xff]  ;;  %v234_v6 = vld [vmem:[%s212_s28 + $0x8] sm:$0xff]  ;;  %v235_v8 = vld [vmem:[%s212_s28 + $0x10] sm:$0xff]  ;;  %s231_s7 = scalar_lea.vmem %s749_s3, %s697_s25 }
  0x10   : > { %570 = vmatpush3.msra.mxu0 %v243_v1  ;;  %592 = vmatpush3.msra.mxu1 %v243_v1  ;;  %v237_v5 = vld [vmem:[%s212_s28 + $0x20] sm:$0xff]  ;;  %v238_v7 = vld [vmem:[%s212_s28 + $0x28] sm:$0xff]  ;;  %v239_v9 = vld [vmem:[%s212_s28 + $0x30] sm:$0xff] }
  0x11   : > { %571 = vmatprep.subr.mxu0 %v242_v2  ;;  %589 = vmatprep.subr.mxu1 %v242_v2  ;;  %v247_v10 = vld [vmem:[%s707_s4 + $0x10] sm:$0xff]  ;;  %v245_v11 = vld [vmem:[%s707_s4] sm:$0xff]  ;;  %v236_v12 = vld [vmem:[%s212_s28 + $0x18] sm:$0xff] }
  0x12   : > { %572 = vmatpush3.msra.mxu0 %v242_v2  ;;  %593 = vmatpush3.msra.mxu1 %v242_v2  ;;  %v240_v13 = vld [vmem:[%s212_s28 + $0x38] sm:$0xff]  ;;  %v246_v16 = vld [vmem:[%s707_s4 + $0x8] sm:$0xff]  ;;  %v249_v18 = vld [vmem:[%s707_s4 + $0x20] sm:$0xff] }
  0x13   : > { %573 = vmatprep.subr.mxu0 %v241_v3  ;;  %590 = vmatprep.subr.mxu1 %v241_v3  ;;  %v248_v15 = vld [vmem:[%s707_s4 + $0x18] sm:$0xff]  ;;  %v250_v17 = vld [vmem:[%s707_s4 + $0x28] sm:$0xff]  ;;  %v251_v20 = vld [vmem:[%s707_s4 + $0x30] sm:$0xff] }
  0x14   : > { %574 = vmatpush3.msra.mxu0 %v241_v3  ;;  %594 = vmatpush3.msra.mxu1 %v241_v3  ;;  %v252_v19 = vld [vmem:[%s707_s4 + $0x38] sm:$0xff] }
  0x15   : > { %575 = vmatprep.mubr.msk.f32.mxu0 %vm293_vm0, %v233_v4  ;;  %581 = vmatprep.mubr.msk.f32.mxu1 %vm293_vm0, %v237_v5 }
  0x16   : > { %576 = vmatmul.mubr.msk.f32.vlgmr.msra.gmra.mxu0 %vm293_vm0, %v234_v6  ;;  %582 = vmatmul.mubr.msk.f32.vlgmr.msra.gmra.mxu1 %vm293_vm0, %v238_v7 }
  0x17   : > { %578 = vmatprep.mubr.msk.f32.mxu0 %vm293_vm0, %v235_v8  ;;  %584 = vmatprep.mubr.msk.f32.mxu1 %vm293_vm0, %v239_v9 }
  0x18   : > { %621 = vset.pattern.permute.xlu1 %v646_v14  ;;  %620 = vset.pattern.permute.xlu0 %v646_v14 }
  0x19   : > { %265 = vperm.xlu1 %621, %v247_v10   ;;  %255 = vperm.xlu0 %620, %v245_v11  }
  0x1a   : > { %579 = vmatmul.mubr.msk.f32.gmra.mxu0 %vm293_vm0, %v236_v12  ;;  %585 = vmatmul.mubr.msk.f32.gmra.mxu1 %vm293_vm0, %v240_v13 }
  0x1d   : > { %270 = vperm.xlu1 %621, %v248_v15   ;;  %260 = vperm.xlu0 %620, %v246_v16  }
  0x21   : > { %280 = vperm.xlu1 %621, %v250_v17   ;;  %275 = vperm.xlu0 %620, %v249_v18  }
  0x25   : > { %290 = vperm.xlu1 %621, %v252_v19   ;;  %285 = vperm.xlu0 %620, %v251_v20  }
  0x94   : > { %v266_v21 = vpop.permute.xlu1 %265  ;;  %v256_v22 = vpop.permute.xlu0 %255 }
  0x98   : > { %v271_v23 = vpop.permute.xlu1 %270  ;;  %v261_v24 = vpop.permute.xlu0 %260 }
  0x9c   : > { %v281_v25 = vpop.permute.xlu1 %280  ;;  %v276_v26 = vpop.permute.xlu0 %275 }
  0xa0   : > { %v291_v33 = vpop.permute.xlu1 %290  ;;  %v286_v38 = vpop.permute.xlu0 %285 }
  0xd6   : > { %v577_v27 = vpop.f32.mrf.mxu0  ;;  %v583_v28 = vpop.f32.mrf.mxu1 }
  0xd7   : > { %v390_v29 = vadd.f32 %v577_v27, %v261_v24  ;;  %v410_v30 = vadd.f32 %v583_v28, %v281_v25 }
  0xd8   : > { %v384_v31 = vpop.f32.mrf.mxu0  ;;  %v404_v32 = vpop.f32.mrf.mxu1 }
  0xd9   : > { %424 = vst.msk [vmem:[%s231_s7 + $0x8] sm:$0xff] %vm293_vm0, %v390_v29  ;;  %428 = vst.msk [vmem:[%s231_s7 + $0x28] sm:$0xff] %vm293_vm0, %v410_v30  ;;  %v385_v34 = vadd.f32 %v384_v31, %v256_v22  ;;  %v405_v35 = vadd.f32 %v404_v32, %v276_v26 }
  0xda   : > { %v580_v36 = vpop.f32.mrf.mxu0  ;;  %v586_v37 = vpop.f32.mrf.mxu1 }
  0xdb   : > { %423 = vst.msk [vmem:[%s231_s7] sm:$0xff] %vm293_vm0, %v385_v34  ;;  %427 = vst.msk [vmem:[%s231_s7 + $0x20] sm:$0xff] %vm293_vm0, %v405_v35  ;;  %v400_v39 = vadd.f32 %v580_v36, %v271_v23  ;;  %v420_v40 = vadd.f32 %v586_v37, %v291_v33 }
  0xdc   : > { %v394_v41 = vpop.f32.mrf.mxu0  ;;  %v414_v42 = vpop.f32.mrf.mxu1 }
  0xdd   : > { %426 = vst.msk [vmem:[%s231_s7 + $0x18] sm:$0xff] %vm293_vm0, %v400_v39  ;;  %430 = vst.msk [vmem:[%s231_s7 + $0x38] sm:$0xff] %vm293_vm0, %v420_v40  ;;  %v395_v43 = vadd.f32 %v394_v41, %v266_v21  ;;  %v415_v44 = vadd.f32 %v414_v42, %v286_v38 }
  0xdf   : > { %425 = vst.msk [vmem:[%s231_s7 + $0x10] sm:$0xff] %vm293_vm0, %v395_v43  ;;  %429 = vst.msk [vmem:[%s231_s7 + $0x30] sm:$0xff] %vm293_vm0, %v415_v44 }
  0xe0 PF: > { %s13_s14 = sadd.s32 1, %s644_s14   ;;  %s750_s12 = smov %s640_s13 }
  0xe1   : > { %p10_p5 = scmp.ge.s32.totalorder %s13_s14, 4   ;;  %s751_s13 = smov %s753_s15 }
  0xe3   :  { %12 = sbr.rel (!%p10_p5) target bundleno = 2 (0x2), region = 68 }

</bundles_post_ra>
